<compile_context>
chip_gen: v7x
topology: tpu7x:2x2x1
jax: 0.10.0
libtpu: 0.0.40
codegen_flags: <defaults>
</compile_context>

<pallas_src>
import functools

import jax
import jax.numpy as jnp
from jax.experimental import pallas as pl
from jax.experimental.pallas import tpu as pltpu

FEAT_DIM = 1280      # EfficientNet-B0 feature dim
HIDDEN_SIZE = 128    # module global
NUM_LAYERS = 1
OUTPUT_SIZE = 1


# --------------------------------------------------------------------------
# Kernel 1: in-kernel GAP + fully folded (surrogate-CNN + LSTM-input) projection.
# Reads x in original (B, T, C, HW) layout, writes time-major bf16 gate blocks.
# --------------------------------------------------------------------------
def gap_proj_kernel(x_ref, wg_ref, bg_ref, gf_ref, gb_ref, *, c, h, inv_hw):
    x = x_ref[...]                                         # (B, 1, C, HW) f32, timestep t
    # GAP + projection as C broadcast-FMAs (C is tiny; avoids a K=C MXU pass).
    acc = None
    for ci in range(c):
        m = jnp.sum(x[:, 0, ci, :], axis=-1, keepdims=True) * inv_hw   # (B, 1) channel mean
        term = m * wg_ref[ci:ci + 1, :]                                 # (B, 8H)
        acc = term if acc is None else acc + term
    gates = acc + bg_ref[...]                              # + (b_feat@Wih + b_ih + b_hh)
    gf_ref[0] = gates[:, : 4 * h].astype(gf_ref.dtype)     # forward-direction gates (bf16)
    gb_ref[0] = gates[:, 4 * h:].astype(gb_ref.dtype)      # backward-direction gates (bf16)


def gap_proj(x4, wg, bg, *, B, T, C, HW, H):
    # NOTE: for large B, add a second grid axis over batch tiles (multiples of 8 sublanes);
    # here the full (small) batch is one block, which satisfies the (8,128) rule via
    # full-dimension blocks.
    kernel = functools.partial(gap_proj_kernel, c=C, h=H, inv_hw=1.0 / HW)
    return pl.pallas_call(
        kernel,
        out_shape=(jax.ShapeDtypeStruct((T, B, 4 * H), jnp.bfloat16),
                   jax.ShapeDtypeStruct((T, B, 4 * H), jnp.bfloat16)),
        grid=(T,),
        in_specs=[
            pl.BlockSpec((B, 1, C, HW), lambda t: (0, t, 0, 0)),   # frames @ t (orig layout)
            pl.BlockSpec((C, 8 * H), lambda t: (0, 0)),            # folded weight (resident)
            pl.BlockSpec((1, 8 * H), lambda t: (0, 0)),            # folded bias (resident)
        ],
        out_specs=(pl.BlockSpec((1, B, 4 * H), lambda t: (t, 0, 0)),
                   pl.BlockSpec((1, B, 4 * H), lambda t: (t, 0, 0))),
        compiler_params=pltpu.CompilerParams(dimension_semantics=("parallel",)),
    )(x4, wg, bg)


# --------------------------------------------------------------------------
# Kernel 2: streamed bidirectional LSTM recurrence (length-masked) + Linear head.
# grid=(T,) "arbitrary"; per-direction (h, c) carried in VMEM scratch.
# --------------------------------------------------------------------------
def bilstm_fc_kernel(lens_ref, gf_ref, gb_ref, whh_f_ref, whh_b_ref,
                     wfc_f_ref, wfc_b_ref, bfc_ref, out_ref,
                     hf, cf, hb, cb, *, T, H):
    t = pl.program_id(0)

    @pl.when(t == 0)
    def _init():
        hf[...] = jnp.zeros_like(hf)
        cf[...] = jnp.zeros_like(cf)
        hb[...] = jnp.zeros_like(hb)
        cb[...] = jnp.zeros_like(cb)

    lens = lens_ref[...]                                   # (B, 1) int32

    def cell(xg, h, c, whh_ref):
        # PyTorch gate order i, f, g, o.  xg already holds x@Wih + b_ih + b_hh (bf16).
        g = xg.astype(jnp.float32) + jnp.dot(
            h.astype(jnp.bfloat16), whh_ref[...], preferred_element_type=jnp.float32)
        i = jax.nn.sigmoid(g[:, 0 * H:1 * H])
        f = jax.nn.sigmoid(g[:, 1 * H:2 * H])
        gg = jnp.tanh(g[:, 2 * H:3 * H])
        o = jax.nn.sigmoid(g[:, 3 * H:4 * H])
        c_new = f * c + i * gg
        return o * jnp.tanh(c_new), c_new

    # forward direction at time t (keeps state of last valid step t = len-1)
    hf_new, cf_new = cell(gf_ref[0], hf[...], cf[...], whh_f_ref)
    vf = t < lens
    hf[...] = jnp.where(vf, hf_new, hf[...])
    cf[...] = jnp.where(vf, cf_new, cf[...])

    # backward direction at time T-1-t (starts once T-1-t < len, carries to t = 0)
    hb_new, cb_new = cell(gb_ref[0], hb[...], cb[...], whh_b_ref)
    vb = (T - 1 - t) < lens
    hb[...] = jnp.where(vb, hb_new, hb[...])
    cb[...] = jnp.where(vb, cb_new, cb[...])

    @pl.when(t == T - 1)
    def _final():
        # fc(concat(h_f, h_b)) as split-weight lane reductions (no concat, no N=1 matmul).
        out_ref[...] = (
            jnp.sum(hf[...] * wfc_f_ref[...], axis=-1, keepdims=True)
            + jnp.sum(hb[...] * wfc_b_ref[...], axis=-1, keepdims=True)
            + bfc_ref[...])


def bilstm_fc(gf, gb, lens, whh_f, whh_b, wfc_f, wfc_b, bfc, *, B, T, H):
    kernel = functools.partial(bilstm_fc_kernel, T=T, H=H)
    return pl.pallas_call(
        kernel,
        out_shape=jax.ShapeDtypeStruct((B, OUTPUT_SIZE), jnp.float32),
        grid=(T,),
        in_specs=[
            pl.BlockSpec((B, 1), lambda t: (0, 0)),                    # lengths (resident)
            pl.BlockSpec((1, B, 4 * H), lambda t: (t, 0, 0)),          # gf[t]       (bf16)
            pl.BlockSpec((1, B, 4 * H), lambda t: (T - 1 - t, 0, 0)),  # gb[T-1-t]   (bf16)
            pl.BlockSpec((H, 4 * H), lambda t: (0, 0)),                # Whh fwd (resident)
            pl.BlockSpec((H, 4 * H), lambda t: (0, 0)),                # Whh bwd (resident)
            pl.BlockSpec((1, H), lambda t: (0, 0)),                    # Wfc fwd half (row)
            pl.BlockSpec((1, H), lambda t: (0, 0)),                    # Wfc bwd half (row)
            pl.BlockSpec((1, 1), lambda t: (0, 0)),                    # fc bias
        ],
        out_specs=pl.BlockSpec((B, OUTPUT_SIZE), lambda t: (0, 0)),
        scratch_shapes=[pltpu.VMEM((B, H), jnp.float32)] * 4,          # h_f, c_f, h_b, c_b
        compiler_params=pltpu.CompilerParams(dimension_semantics=("arbitrary",)),
    )(lens, gf, gb, whh_f, whh_b, wfc_f, wfc_b, bfc)


# --------------------------------------------------------------------------
# Wrapper: full CNNLSTMModel.forward
# --------------------------------------------------------------------------
def cnn_lstm_forward(x, lengths, params):
    # x: (B, T, C, H, W) float32, lengths: (B,) int
    B, T, C, Hi, Wi = x.shape
    HW = Hi * Wi
    H = HIDDEN_SIZE

    x4 = x.reshape(B, T, C, HW)   # merge trailing dims only: free (bitcast) reshape

    # Weight preprocessing (done once per call here; static in real deployment):
    # fold the surrogate-CNN Linear and the LSTM input projection into one (C, 8H) weight
    # and fold b_feat + b_ih + b_hh into a single (1, 8H) gate bias.
    wih_cat = jnp.concatenate([params["wih_f"], params["wih_b"]], axis=1)     # (1280, 8H)
    bih_cat = jnp.concatenate([params["b_f"], params["b_b"]], axis=1)         # (1, 8H)
    wg = jnp.dot(params["w_feat"], wih_cat)                                   # (C, 8H)
    bg = jnp.dot(params["b_feat"], wih_cat) + bih_cat                         # (1, 8H)

    gf, gb = gap_proj(x4, wg, bg, B=B, T=T, C=C, HW=HW, H=H)

    lens = lengths.astype(jnp.int32).reshape(B, 1)
    out = bilstm_fc(
        gf, gb, lens,
        params["whh_f"].astype(jnp.bfloat16),
        params["whh_b"].astype(jnp.bfloat16),
        params["wfc"][:H].T, params["wfc"][H:].T, params["bfc"],
        B=B, T=T, H=H)
    return out


# --------------------------------------------------------------------------
# Pure-JAX reference (f32) for correctness checking
# --------------------------------------------------------------------------
def reference_forward(x, lengths, params):
    B, T, C, Hi, Wi = x.shape
    H = HIDDEN_SIZE
    gap = x.reshape(B, T, C, Hi * Wi).mean(axis=-1)                   # (B, T, C)
    feats = jnp.dot(gap, params["w_feat"]) + params["b_feat"]         # (B, T, 1280)
    valid = jnp.arange(T)[None, :] < lengths[:, None].astype(jnp.int32)   # (B, T)

    def direction(wih, whh, b, reverse):
        xg_all = jnp.dot(feats, wih) + b                              # (B, T, 4H)
        xs_g = jnp.moveaxis(xg_all, 1, 0)                             # (T, B, 4H)
        xs_v = jnp.moveaxis(valid[..., None], 1, 0)                   # (T, B, 1)
        if reverse:
            xs_g, xs_v = xs_g[::-1], xs_v[::-1]

        def cell(carry, inp):
            h, c = carry
            xg, v = inp
            g = xg + jnp.dot(h, whh)
            i = jax.nn.sigmoid(g[:, :H])
            f = jax.nn.sigmoid(g[:, H:2 * H])
            gg = jnp.tanh(g[:, 2 * H:3 * H])
            o = jax.nn.sigmoid(g[:, 3 * H:])
            c_new = f * c + i * gg
            h_new = o * jnp.tanh(c_new)
            return (jnp.where(v, h_new, h), jnp.where(v, c_new, c)), None

        (h, _), _ = jax.lax.scan(cell, (jnp.zeros((B, H)), jnp.zeros((B, H))),
                                 (xs_g, xs_v))
        return h

    h_f = direction(params["wih_f"], params["whh_f"], params["b_f"], False)
    h_b = direction(params["wih_b"], params["whh_b"], params["b_b"], True)
    ht = jnp.concatenate([h_f, h_b], axis=1)
    return jnp.dot(ht, params["wfc"]) + params["bfc"]


# --------------------------------------------------------------------------
# Deterministic parameter init (shapes implied by the PyTorch module)
# --------------------------------------------------------------------------
def init_params(key, c_in, hidden, feat_dim=FEAT_DIM, out_dim=OUTPUT_SIZE):
    keys = jax.random.split(key, 12)
    k_lstm = 1.0 / jnp.sqrt(hidden)
    k_fc = 1.0 / jnp.sqrt(2.0 * hidden)
    u = lambda k, shape, s: jax.random.uniform(k, shape, jnp.float32, -s, s)
    params = {
        # surrogate feature extractor: GAP + Linear(c_in -> 1280)
        "w_feat": u(keys[0], (c_in, feat_dim), 1.0 / jnp.sqrt(c_in)),
        "b_feat": u(keys[1], (1, feat_dim), 1.0 / jnp.sqrt(c_in)),
        # LSTM, forward direction (weights pre-transposed: (in, 4H) / (H, 4H))
        "wih_f": u(keys[2], (feat_dim, 4 * hidden), k_lstm),
        "whh_f": u(keys[3], (hidden, 4 * hidden), k_lstm),
        # b_ih + b_hh folded into one bias
        "b_f": u(keys[4], (1, 4 * hidden), k_lstm) + u(keys[5], (1, 4 * hidden), k_lstm),
        # LSTM, backward direction
        "wih_b": u(keys[6], (feat_dim, 4 * hidden), k_lstm),
        "whh_b": u(keys[7], (hidden, 4 * hidden), k_lstm),
        "b_b": u(keys[8], (1, 4 * hidden), k_lstm) + u(keys[9], (1, 4 * hidden), k_lstm),
        # fc: Linear(2H -> 1)
        "wfc": u(keys[10], (2 * hidden, out_dim), k_fc),
        "bfc": u(keys[11], (1, out_dim), k_fc),
    }
    return params


if __name__ == "__main__":
    key = jax.random.PRNGKey(0)
    k_x, k_p = jax.random.split(key)

    B, T, C, H_img, W_img = 2, 8, 3, 16, 16
    x = jax.random.normal(k_x, (B, T, C, H_img, W_img), jnp.float32)
    lengths = jnp.array([8, 5], dtype=jnp.int32)   # valid steps per sequence

    params = init_params(k_p, C, HIDDEN_SIZE)

    fwd = jax.jit(cnn_lstm_forward)
    out = jax.block_until_ready(fwd(x, lengths, params))

    assert out.shape == (B, OUTPUT_SIZE), out.shape
    assert jnp.all(jnp.isfinite(out))

    ref = jax.block_until_ready(reference_forward(x, lengths, params))
    assert jnp.allclose(out, ref, atol=5e-2, rtol=5e-2), (out, ref)

    print("KERNEL_OK")
</pallas_src>

<mosaic_0001>
module attributes {stable_mosaic.version = 11 : i64} {
  func.func @gap_proj_kernel(%arg0: i32, %arg1: memref<2x1x3x256xf32, #tpu.memory_space<vmem>>, %arg2: memref<3x1024xf32, #tpu.memory_space<vmem>>, %arg3: memref<1x1024xf32, #tpu.memory_space<vmem>>, %arg4: memref<1x2x512xbf16, #tpu.memory_space<vmem>>, %arg5: memref<1x2x512xbf16, #tpu.memory_space<vmem>>) attributes {dimension_semantics = [#tpu.dimension_semantics<parallel>], iteration_bounds = array<i64: 8>, scalar_prefetch = 0 : i64, scratch_operands = 0 : i64, tpu.core_type = #tpu.core_type<tc>, window_params = [{transform_indices = @transform_0, window_bounds = array<i64: 2, 1, 3, 256>}, {pipeline_mode = #tpu.pipeline_mode<synchronous>, transform_indices = @transform_1, window_bounds = array<i64: 3, 1024>}, {pipeline_mode = #tpu.pipeline_mode<synchronous>, transform_indices = @transform_2, window_bounds = array<i64: 1, 1024>}, {transform_indices = @transform_3, window_bounds = array<i64: 1, 2, 512>}, {transform_indices = @transform_4, window_bounds = array<i64: 1, 2, 512>}]} {
    %c0 = arith.constant 0 : index
    %c0_0 = arith.constant 0 : index
    %c0_1 = arith.constant 0 : index
    %c0_2 = arith.constant 0 : index
    %0 = vector.load %arg1[%c0, %c0_0, %c0_1, %c0_2] : memref<2x1x3x256xf32, #tpu.memory_space<vmem>>, vector<2x1x3x256xf32>
    %1 = vector.extract_strided_slice %0 {offsets = [0, 0, 0, 0], sizes = [2, 1, 1, 256], strides = [1, 1, 1, 1]} : vector<2x1x3x256xf32> to vector<2x1x1x256xf32>
    %2 = vector.shape_cast %1 : vector<2x1x1x256xf32> to vector<2x256xf32>
    %cst = arith.constant dense<0.000000e+00> : vector<2xf32>
    %3 = vector.multi_reduction <add>, %2, %cst [1] : vector<2x256xf32> to vector<2xf32>
    %4 = vector.shape_cast %3 : vector<2xf32> to vector<2x1xf32>
    %cst_3 = arith.constant 3.906250e-03 : f32
    %5 = vector.broadcast %cst_3 : f32 to vector<2x1xf32>
    %6 = arith.mulf %4, %5 : vector<2x1xf32>
    %c0_4 = arith.constant 0 : index
    %c0_5 = arith.constant 0 : index
    %7 = vector.load %arg2[%c0_4, %c0_5] : memref<3x1024xf32, #tpu.memory_space<vmem>>, vector<1x1024xf32>
    %8 = vector.broadcast %6 : vector<2x1xf32> to vector<2x1024xf32>
    %9 = vector.broadcast %7 : vector<1x1024xf32> to vector<2x1024xf32>
    %10 = arith.mulf %8, %9 : vector<2x1024xf32>
    %11 = vector.extract_strided_slice %0 {offsets = [0, 0, 1, 0], sizes = [2, 1, 1, 256], strides = [1, 1, 1, 1]} : vector<2x1x3x256xf32> to vector<2x1x1x256xf32>
    %12 = vector.shape_cast %11 : vector<2x1x1x256xf32> to vector<2x256xf32>
    %cst_6 = arith.constant dense<0.000000e+00> : vector<2xf32>
    %13 = vector.multi_reduction <add>, %12, %cst_6 [1] : vector<2x256xf32> to vector<2xf32>
    %14 = vector.shape_cast %13 : vector<2xf32> to vector<2x1xf32>
    %cst_7 = arith.constant 3.906250e-03 : f32
    %15 = vector.broadcast %cst_7 : f32 to vector<2x1xf32>
    %16 = arith.mulf %14, %15 : vector<2x1xf32>
    %c1 = arith.constant 1 : index
    %c0_8 = arith.constant 0 : index
    %17 = vector.load %arg2[%c1, %c0_8] : memref<3x1024xf32, #tpu.memory_space<vmem>>, vector<1x1024xf32>
    %18 = vector.broadcast %16 : vector<2x1xf32> to vector<2x1024xf32>
    %19 = vector.broadcast %17 : vector<1x1024xf32> to vector<2x1024xf32>
    %20 = arith.mulf %18, %19 : vector<2x1024xf32>
    %21 = arith.addf %10, %20 : vector<2x1024xf32>
    %22 = vector.extract_strided_slice %0 {offsets = [0, 0, 2, 0], sizes = [2, 1, 1, 256], strides = [1, 1, 1, 1]} : vector<2x1x3x256xf32> to vector<2x1x1x256xf32>
    %23 = vector.shape_cast %22 : vector<2x1x1x256xf32> to vector<2x256xf32>
    %cst_9 = arith.constant dense<0.000000e+00> : vector<2xf32>
    %24 = vector.multi_reduction <add>, %23, %cst_9 [1] : vector<2x256xf32> to vector<2xf32>
    %25 = vector.shape_cast %24 : vector<2xf32> to vector<2x1xf32>
    %cst_10 = arith.constant 3.906250e-03 : f32
    %26 = vector.broadcast %cst_10 : f32 to vector<2x1xf32>
    %27 = arith.mulf %25, %26 : vector<2x1xf32>
    %c2 = arith.constant 2 : index
    %c0_11 = arith.constant 0 : index
    %28 = vector.load %arg2[%c2, %c0_11] : memref<3x1024xf32, #tpu.memory_space<vmem>>, vector<1x1024xf32>
    %29 = vector.broadcast %27 : vector<2x1xf32> to vector<2x1024xf32>
    %30 = vector.broadcast %28 : vector<1x1024xf32> to vector<2x1024xf32>
    %31 = arith.mulf %29, %30 : vector<2x1024xf32>
    %32 = arith.addf %21, %31 : vector<2x1024xf32>
    %c0_12 = arith.constant 0 : index
    %c0_13 = arith.constant 0 : index
    %33 = vector.load %arg3[%c0_12, %c0_13] : memref<1x1024xf32, #tpu.memory_space<vmem>>, vector<1x1024xf32>
    %34 = vector.broadcast %33 : vector<1x1024xf32> to vector<2x1024xf32>
    %35 = arith.addf %32, %34 : vector<2x1024xf32>
    %36 = vector.extract_strided_slice %35 {offsets = [0, 0], sizes = [2, 512], strides = [1, 1]} : vector<2x1024xf32> to vector<2x512xf32>
    %37 = arith.truncf %36 : vector<2x512xf32> to vector<2x512xbf16>
    %c0_14 = arith.constant 0 : index
    %c0_15 = arith.constant 0 : index
    %c0_16 = arith.constant 0 : index
    %38 = vector.load %arg4[%c0_14, %c0_15, %c0_16] : memref<1x2x512xbf16, #tpu.memory_space<vmem>>, vector<1x2x512xbf16>
    %39 = vector.shape_cast %38 : vector<1x2x512xbf16> to vector<2x512xbf16>
    %40 = vector.shape_cast %37 : vector<2x512xbf16> to vector<1x2x512xbf16>
    tpu.vector_store %arg4[%c0_14, %c0_15, %c0_16], %40 {strides = array<i32>} : memref<1x2x512xbf16, #tpu.memory_space<vmem>>, vector<1x2x512xbf16>,
    %41 = vector.extract_strided_slice %35 {offsets = [0, 512], sizes = [2, 512], strides = [1, 1]} : vector<2x1024xf32> to vector<2x512xf32>
    %42 = arith.truncf %41 : vector<2x512xf32> to vector<2x512xbf16>
    %c0_17 = arith.constant 0 : index
    %c0_18 = arith.constant 0 : index
    %c0_19 = arith.constant 0 : index
    %43 = vector.load %arg5[%c0_17, %c0_18, %c0_19] : memref<1x2x512xbf16, #tpu.memory_space<vmem>>, vector<1x2x512xbf16>
    %44 = vector.shape_cast %43 : vector<1x2x512xbf16> to vector<2x512xbf16>
    %45 = vector.shape_cast %42 : vector<2x512xbf16> to vector<1x2x512xbf16>
    tpu.vector_store %arg5[%c0_17, %c0_18, %c0_19], %45 {strides = array<i32>} : memref<1x2x512xbf16, #tpu.memory_space<vmem>>, vector<1x2x512xbf16>,
    return
  }
  func.func @transform_0(%arg0: i32) -> (i32, i32, i32, i32) {
    %c0_i32 = arith.constant 0 : i32
    %c0_i32_0 = arith.constant 0 : i32
    %c0_i32_1 = arith.constant 0 : i32
    %c0_i32_2 = arith.constant 0 : i32
    return %c0_i32, %arg0, %c0_i32_0, %c0_i32_1 : i32, i32, i32, i32
  }
  func.func @transform_1(%arg0: i32) -> (i32, i32) {
    %c0_i32 = arith.constant 0 : i32
    %c0_i32_0 = arith.constant 0 : i32
    %c0_i32_1 = arith.constant 0 : i32
    return %c0_i32, %c0_i32_0 : i32, i32
  }
  func.func @transform_2(%arg0: i32) -> (i32, i32) {
    %c0_i32 = arith.constant 0 : i32
    %c0_i32_0 = arith.constant 0 : i32
    %c0_i32_1 = arith.constant 0 : i32
    return %c0_i32, %c0_i32_0 : i32, i32
  }
  func.func @transform_3(%arg0: i32) -> (i32, i32, i32) {
    %c0_i32 = arith.constant 0 : i32
    %c0_i32_0 = arith.constant 0 : i32
    %c0_i32_1 = arith.constant 0 : i32
    return %arg0, %c0_i32, %c0_i32_0 : i32, i32, i32
  }
  func.func @transform_4(%arg0: i32) -> (i32, i32, i32) {
    %c0_i32 = arith.constant 0 : i32
    %c0_i32_0 = arith.constant 0 : i32
    %c0_i32_1 = arith.constant 0 : i32
    return %arg0, %c0_i32, %c0_i32_0 : i32, i32, i32
  }
}

module attributes {stable_mosaic.version = 11 : i64} {
  func.func @bilstm_fc_kernel(%arg0: i32, %arg1: memref<2x1xi32, #tpu.memory_space<vmem>>, %arg2: memref<1x2x512xbf16, #tpu.memory_space<vmem>>, %arg3: memref<1x2x512xbf16, #tpu.memory_space<vmem>>, %arg4: memref<128x512xbf16, #tpu.memory_space<vmem>>, %arg5: memref<128x512xbf16, #tpu.memory_space<vmem>>, %arg6: memref<1x128xf32, #tpu.memory_space<vmem>>, %arg7: memref<1x128xf32, #tpu.memory_space<vmem>>, %arg8: memref<1x1xf32, #tpu.memory_space<vmem>>, %arg9: memref<2x1xf32, #tpu.memory_space<vmem>>, %arg10: memref<2x128xf32, #tpu.memory_space<vmem>>, %arg11: memref<2x128xf32, #tpu.memory_space<vmem>>, %arg12: memref<2x128xf32, #tpu.memory_space<vmem>>, %arg13: memref<2x128xf32, #tpu.memory_space<vmem>>) attributes {dimension_semantics = [#tpu.dimension_semantics<arbitrary>], iteration_bounds = array<i64: 8>, scalar_prefetch = 0 : i64, scratch_operands = 4 : i64, tpu.core_type = #tpu.core_type<tc>, window_params = [{pipeline_mode = #tpu.pipeline_mode<synchronous>, transform_indices = @transform_0, window_bounds = array<i64: 2, 1>}, {transform_indices = @transform_1, window_bounds = array<i64: 1, 2, 512>}, {transform_indices = @transform_2, window_bounds = array<i64: 1, 2, 512>}, {pipeline_mode = #tpu.pipeline_mode<synchronous>, transform_indices = @transform_3, window_bounds = array<i64: 128, 512>}, {pipeline_mode = #tpu.pipeline_mode<synchronous>, transform_indices = @transform_4, window_bounds = array<i64: 128, 512>}, {pipeline_mode = #tpu.pipeline_mode<synchronous>, transform_indices = @transform_5, window_bounds = array<i64: 1, 128>}, {pipeline_mode = #tpu.pipeline_mode<synchronous>, transform_indices = @transform_6, window_bounds = array<i64: 1, 128>}, {pipeline_mode = #tpu.pipeline_mode<synchronous>, transform_indices = @transform_7, window_bounds = array<i64: 1, 1>}, {pipeline_mode = #tpu.pipeline_mode<synchronous>, transform_indices = @transform_8, window_bounds = array<i64: 2, 1>}]} {
    %c0_i32 = arith.constant 0 : i32
    %0 = arith.cmpi eq, %arg0, %c0_i32 : i32
    %1 = arith.extui %0 : i1 to i32
    %c0_i32_0 = arith.constant 0 : i32
    %2 = arith.cmpi ne, %1, %c0_i32_0 : i32
    scf.if %2 {
      %cst_45 = arith.constant 0.000000e+00 : f32
      %100 = vector.broadcast %cst_45 : f32 to vector<2x128xf32>
      %c0_46 = arith.constant 0 : index
      %c0_47 = arith.constant 0 : index
      %101 = vector.load %arg10[%c0_46, %c0_47] : memref<2x128xf32, #tpu.memory_space<vmem>>, vector<2x128xf32>
      tpu.vector_store %arg10[%c0_46, %c0_47], %100 {strides = array<i32>} : memref<2x128xf32, #tpu.memory_space<vmem>>, vector<2x128xf32>,
      %cst_48 = arith.constant 0.000000e+00 : f32
      %102 = vector.broadcast %cst_48 : f32 to vector<2x128xf32>
      %c0_49 = arith.constant 0 : index
      %c0_50 = arith.constant 0 : index
      %103 = vector.load %arg11[%c0_49, %c0_50] : memref<2x128xf32, #tpu.memory_space<vmem>>, vector<2x128xf32>
      tpu.vector_store %arg11[%c0_49, %c0_50], %102 {strides = array<i32>} : memref<2x128xf32, #tpu.memory_space<vmem>>, vector<2x128xf32>,
      %cst_51 = arith.constant 0.000000e+00 : f32
      %104 = vector.broadcast %cst_51 : f32 to vector<2x128xf32>
      %c0_52 = arith.constant 0 : index
      %c0_53 = arith.constant 0 : index
      %105 = vector.load %arg12[%c0_52, %c0_53] : memref<2x128xf32, #tpu.memory_space<vmem>>, vector<2x128xf32>
      tpu.vector_store %arg12[%c0_52, %c0_53], %104 {strides = array<i32>} : memref<2x128xf32, #tpu.memory_space<vmem>>, vector<2x128xf32>,
      %cst_54 = arith.constant 0.000000e+00 : f32
      %106 = vector.broadcast %cst_54 : f32 to vector<2x128xf32>
      %c0_55 = arith.constant 0 : index
      %c0_56 = arith.constant 0 : index
      %107 = vector.load %arg13[%c0_55, %c0_56] : memref<2x128xf32, #tpu.memory_space<vmem>>, vector<2x128xf32>
      tpu.vector_store %arg13[%c0_55, %c0_56], %106 {strides = array<i32>} : memref<2x128xf32, #tpu.memory_space<vmem>>, vector<2x128xf32>,
    } else {
    }
    %c0 = arith.constant 0 : index
    %c0_1 = arith.constant 0 : index
    %3 = vector.load %arg1[%c0, %c0_1] : memref<2x1xi32, #tpu.memory_space<vmem>>, vector<2x1xi32>
    %c0_2 = arith.constant 0 : index
    %c0_3 = arith.constant 0 : index
    %c0_4 = arith.constant 0 : index
    %4 = vector.load %arg2[%c0_2, %c0_3, %c0_4] : memref<1x2x512xbf16, #tpu.memory_space<vmem>>, vector<1x2x512xbf16>
    %5 = vector.shape_cast %4 : vector<1x2x512xbf16> to vector<2x512xbf16>
    %c0_5 = arith.constant 0 : index
    %c0_6 = arith.constant 0 : index
    %6 = vector.load %arg10[%c0_5, %c0_6] : memref<2x128xf32, #tpu.memory_space<vmem>>, vector<2x128xf32>
    %c0_7 = arith.constant 0 : index
    %c0_8 = arith.constant 0 : index
    %7 = vector.load %arg11[%c0_7, %c0_8] : memref<2x128xf32, #tpu.memory_space<vmem>>, vector<2x128xf32>
    %8 = arith.extf %5 : vector<2x512xbf16> to vector<2x512xf32>
    %9 = arith.truncf %6 : vector<2x128xf32> to vector<2x128xbf16>
    %c0_9 = arith.constant 0 : index
    %c0_10 = arith.constant 0 : index
    %10 = vector.load %arg4[%c0_9, %c0_10] : memref<128x512xbf16, #tpu.memory_space<vmem>>, vector<128x512xbf16>
    %cst = arith.constant dense<0.000000e+00> : vector<2x512xf32>
    %11 = tpu.matmul %9, %10, %cst {dimension_numbers = #tpu.dot_dimension_numbers<[1], [0], [0], [1], [0, 0, 1, 1], [], []>} : vector<2x128xbf16>, vector<128x512xbf16>, vector<2x512xf32> -> vector<2x512xf32>
    %12 = arith.addf %8, %11 : vector<2x512xf32>
    %13 = vector.extract_strided_slice %12 {offsets = [0, 0], sizes = [2, 128], strides = [1, 1]} : vector<2x512xf32> to vector<2x128xf32>
    %14 = arith.negf %13 : vector<2x128xf32>
    %15 = math.exp %14 : vector<2x128xf32>
    %cst_11 = arith.constant 1.000000e+00 : f32
    %16 = vector.broadcast %cst_11 : f32 to vector<2x128xf32>
    %17 = arith.addf %16, %15 : vector<2x128xf32>
    %18 = arith.divf %16, %17 : vector<2x128xf32>
    %19 = vector.extract_strided_slice %12 {offsets = [0, 128], sizes = [2, 128], strides = [1, 1]} : vector<2x512xf32> to vector<2x128xf32>
    %20 = arith.negf %19 : vector<2x128xf32>
    %21 = math.exp %20 : vector<2x128xf32>
    %cst_12 = arith.constant 1.000000e+00 : f32
    %22 = vector.broadcast %cst_12 : f32 to vector<2x128xf32>
    %23 = arith.addf %22, %21 : vector<2x128xf32>
    %24 = arith.divf %22, %23 : vector<2x128xf32>
    %25 = vector.extract_strided_slice %12 {offsets = [0, 256], sizes = [2, 128], strides = [1, 1]} : vector<2x512xf32> to vector<2x128xf32>
    %26 = math.tanh %25 : vector<2x128xf32>
    %27 = vector.extract_strided_slice %12 {offsets = [0, 384], sizes = [2, 128], strides = [1, 1]} : vector<2x512xf32> to vector<2x128xf32>
    %28 = arith.negf %27 : vector<2x128xf32>
    %29 = math.exp %28 : vector<2x128xf32>
    %cst_13 = arith.constant 1.000000e+00 : f32
    %30 = vector.broadcast %cst_13 : f32 to vector<2x128xf32>
    %31 = arith.addf %30, %29 : vector<2x128xf32>
    %32 = arith.divf %30, %31 : vector<2x128xf32>
    %33 = arith.mulf %24, %7 : vector<2x128xf32>
    %34 = arith.mulf %18, %26 : vector<2x128xf32>
    %35 = arith.addf %33, %34 : vector<2x128xf32>
    %36 = math.tanh %35 : vector<2x128xf32>
    %37 = arith.mulf %32, %36 : vector<2x128xf32>
    %38 = vector.broadcast %arg0 : i32 to vector<2x1xi32>
    %39 = arith.cmpi slt, %38, %3 : vector<2x1xi32>
    %c0_14 = arith.constant 0 : index
    %c0_15 = arith.constant 0 : index
    %40 = vector.load %arg10[%c0_14, %c0_15] : memref<2x128xf32, #tpu.memory_space<vmem>>, vector<2x128xf32>
    %41 = vector.shape_cast %39 : vector<2x1xi1> to vector<2x1xi1>
    %42 = vector.broadcast %41 : vector<2x1xi1> to vector<2x128xi1>
    %43 = arith.select %42, %37, %40 : vector<2x128xi1>, vector<2x128xf32>
    %c0_16 = arith.constant 0 : index
    %c0_17 = arith.constant 0 : index
    %44 = vector.load %arg10[%c0_16, %c0_17] : memref<2x128xf32, #tpu.memory_space<vmem>>, vector<2x128xf32>
    tpu.vector_store %arg10[%c0_16, %c0_17], %43 {strides = array<i32>} : memref<2x128xf32, #tpu.memory_space<vmem>>, vector<2x128xf32>,
    %c0_18 = arith.constant 0 : index
    %c0_19 = arith.constant 0 : index
    %45 = vector.load %arg11[%c0_18, %c0_19] : memref<2x128xf32, #tpu.memory_space<vmem>>, vector<2x128xf32>
    %46 = vector.shape_cast %39 : vector<2x1xi1> to vector<2x1xi1>
    %47 = vector.broadcast %46 : vector<2x1xi1> to vector<2x128xi1>
    %48 = arith.select %47, %35, %45 : vector<2x128xi1>, vector<2x128xf32>
    %c0_20 = arith.constant 0 : index
    %c0_21 = arith.constant 0 : index
    %49 = vector.load %arg11[%c0_20, %c0_21] : memref<2x128xf32, #tpu.memory_space<vmem>>, vector<2x128xf32>
    tpu.vector_store %arg11[%c0_20, %c0_21], %48 {strides = array<i32>} : memref<2x128xf32, #tpu.memory_space<vmem>>, vector<2x128xf32>,
    %c0_22 = arith.constant 0 : index
    %c0_23 = arith.constant 0 : index
    %c0_24 = arith.constant 0 : index
    %50 = vector.load %arg3[%c0_22, %c0_23, %c0_24] : memref<1x2x512xbf16, #tpu.memory_space<vmem>>, vector<1x2x512xbf16>
    %51 = vector.shape_cast %50 : vector<1x2x512xbf16> to vector<2x512xbf16>
    %c0_25 = arith.constant 0 : index
    %c0_26 = arith.constant 0 : index
    %52 = vector.load %arg12[%c0_25, %c0_26] : memref<2x128xf32, #tpu.memory_space<vmem>>, vector<2x128xf32>
    %c0_27 = arith.constant 0 : index
    %c0_28 = arith.constant 0 : index
    %53 = vector.load %arg13[%c0_27, %c0_28] : memref<2x128xf32, #tpu.memory_space<vmem>>, vector<2x128xf32>
    %54 = arith.extf %51 : vector<2x512xbf16> to vector<2x512xf32>
    %55 = arith.truncf %52 : vector<2x128xf32> to vector<2x128xbf16>
    %c0_29 = arith.constant 0 : index
    %c0_30 = arith.constant 0 : index
    %56 = vector.load %arg5[%c0_29, %c0_30] : memref<128x512xbf16, #tpu.memory_space<vmem>>, vector<128x512xbf16>
    %cst_31 = arith.constant dense<0.000000e+00> : vector<2x512xf32>
    %57 = tpu.matmul %55, %56, %cst_31 {dimension_numbers = #tpu.dot_dimension_numbers<[1], [0], [0], [1], [0, 0, 1, 1], [], []>} : vector<2x128xbf16>, vector<128x512xbf16>, vector<2x512xf32> -> vector<2x512xf32>
    %58 = arith.addf %54, %57 : vector<2x512xf32>
    %59 = vector.extract_strided_slice %58 {offsets = [0, 0], sizes = [2, 128], strides = [1, 1]} : vector<2x512xf32> to vector<2x128xf32>
    %60 = arith.negf %59 : vector<2x128xf32>
    %61 = math.exp %60 : vector<2x128xf32>
    %cst_32 = arith.constant 1.000000e+00 : f32
    %62 = vector.broadcast %cst_32 : f32 to vector<2x128xf32>
    %63 = arith.addf %62, %61 : vector<2x128xf32>
    %64 = arith.divf %62, %63 : vector<2x128xf32>
    %65 = vector.extract_strided_slice %58 {offsets = [0, 128], sizes = [2, 128], strides = [1, 1]} : vector<2x512xf32> to vector<2x128xf32>
    %66 = arith.negf %65 : vector<2x128xf32>
    %67 = math.exp %66 : vector<2x128xf32>
    %cst_33 = arith.constant 1.000000e+00 : f32
    %68 = vector.broadcast %cst_33 : f32 to vector<2x128xf32>
    %69 = arith.addf %68, %67 : vector<2x128xf32>
    %70 = arith.divf %68, %69 : vector<2x128xf32>
    %71 = vector.extract_strided_slice %58 {offsets = [0, 256], sizes = [2, 128], strides = [1, 1]} : vector<2x512xf32> to vector<2x128xf32>
    %72 = math.tanh %71 : vector<2x128xf32>
    %73 = vector.extract_strided_slice %58 {offsets = [0, 384], sizes = [2, 128], strides = [1, 1]} : vector<2x512xf32> to vector<2x128xf32>
    %74 = arith.negf %73 : vector<2x128xf32>
    %75 = math.exp %74 : vector<2x128xf32>
    %cst_34 = arith.constant 1.000000e+00 : f32
    %76 = vector.broadcast %cst_34 : f32 to vector<2x128xf32>
    %77 = arith.addf %76, %75 : vector<2x128xf32>
    %78 = arith.divf %76, %77 : vector<2x128xf32>
    %79 = arith.mulf %70, %53 : vector<2x128xf32>
    %80 = arith.mulf %64, %72 : vector<2x128xf32>
    %81 = arith.addf %79, %80 : vector<2x128xf32>
    %82 = math.tanh %81 : vector<2x128xf32>
    %83 = arith.mulf %78, %82 : vector<2x128xf32>
    %c7_i32 = arith.constant 7 : i32
    %84 = arith.subi %c7_i32, %arg0 : i32
    %85 = vector.broadcast %84 : i32 to vector<2x1xi32>
    %86 = arith.cmpi slt, %85, %3 : vector<2x1xi32>
    %c0_35 = arith.constant 0 : index
    %c0_36 = arith.constant 0 : index
    %87 = vector.load %arg12[%c0_35, %c0_36] : memref<2x128xf32, #tpu.memory_space<vmem>>, vector<2x128xf32>
    %88 = vector.shape_cast %86 : vector<2x1xi1> to vector<2x1xi1>
    %89 = vector.broadcast %88 : vector<2x1xi1> to vector<2x128xi1>
    %90 = arith.select %89, %83, %87 : vector<2x128xi1>, vector<2x128xf32>
    %c0_37 = arith.constant 0 : index
    %c0_38 = arith.constant 0 : index
    %91 = vector.load %arg12[%c0_37, %c0_38] : memref<2x128xf32, #tpu.memory_space<vmem>>, vector<2x128xf32>
    tpu.vector_store %arg12[%c0_37, %c0_38], %90 {strides = array<i32>} : memref<2x128xf32, #tpu.memory_space<vmem>>, vector<2x128xf32>,
    %c0_39 = arith.constant 0 : index
    %c0_40 = arith.constant 0 : index
    %92 = vector.load %arg13[%c0_39, %c0_40] : memref<2x128xf32, #tpu.memory_space<vmem>>, vector<2x128xf32>
    %93 = vector.shape_cast %86 : vector<2x1xi1> to vector<2x1xi1>
    %94 = vector.broadcast %93 : vector<2x1xi1> to vector<2x128xi1>
    %95 = arith.select %94, %81, %92 : vector<2x128xi1>, vector<2x128xf32>
    %c0_41 = arith.constant 0 : index
    %c0_42 = arith.constant 0 : index
    %96 = vector.load %arg13[%c0_41, %c0_42] : memref<2x128xf32, #tpu.memory_space<vmem>>, vector<2x128xf32>
    tpu.vector_store %arg13[%c0_41, %c0_42], %95 {strides = array<i32>} : memref<2x128xf32, #tpu.memory_space<vmem>>, vector<2x128xf32>,
    %c7_i32_43 = arith.constant 7 : i32
    %97 = arith.cmpi eq, %arg0, %c7_i32_43 : i32
    %98 = arith.extui %97 : i1 to i32
    %c0_i32_44 = arith.constant 0 : i32
    %99 = arith.cmpi ne, %98, %c0_i32_44 : i32
    scf.if %99 {
      %c0_45 = arith.constant 0 : index
      %c0_46 = arith.constant 0 : index
      %100 = vector.load %arg10[%c0_45, %c0_46] : memref<2x128xf32, #tpu.memory_space<vmem>>, vector<2x128xf32>
      %c0_47 = arith.constant 0 : index
      %c0_48 = arith.constant 0 : index
      %101 = vector.load %arg6[%c0_47, %c0_48] : memref<1x128xf32, #tpu.memory_space<vmem>>, vector<1x128xf32>
      %102 = vector.broadcast %101 : vector<1x128xf32> to vector<2x128xf32>
      %103 = arith.mulf %100, %102 : vector<2x128xf32>
      %cst_49 = arith.constant dense<0.000000e+00> : vector<2xf32>
      %104 = vector.multi_reduction <add>, %103, %cst_49 [1] : vector<2x128xf32> to vector<2xf32>
      %105 = vector.shape_cast %104 : vector<2xf32> to vector<2x1xf32>
      %c0_50 = arith.constant 0 : index
      %c0_51 = arith.constant 0 : index
      %106 = vector.load %arg12[%c0_50, %c0_51] : memref<2x128xf32, #tpu.memory_space<vmem>>, vector<2x128xf32>
      %c0_52 = arith.constant 0 : index
      %c0_53 = arith.constant 0 : index
      %107 = vector.load %arg7[%c0_52, %c0_53] : memref<1x128xf32, #tpu.memory_space<vmem>>, vector<1x128xf32>
      %108 = vector.broadcast %107 : vector<1x128xf32> to vector<2x128xf32>
      %109 = arith.mulf %106, %108 : vector<2x128xf32>
      %cst_54 = arith.constant dense<0.000000e+00> : vector<2xf32>
      %110 = vector.multi_reduction <add>, %109, %cst_54 [1] : vector<2x128xf32> to vector<2xf32>
      %111 = vector.shape_cast %110 : vector<2xf32> to vector<2x1xf32>
      %112 = arith.addf %105, %111 : vector<2x1xf32>
      %c0_55 = arith.constant 0 : index
      %c0_56 = arith.constant 0 : index
      %113 = vector.load %arg8[%c0_55, %c0_56] : memref<1x1xf32, #tpu.memory_space<vmem>>, vector<1x1xf32>
      %114 = vector.broadcast %113 : vector<1x1xf32> to vector<2x1xf32>
      %115 = arith.addf %112, %114 : vector<2x1xf32>
      %c0_57 = arith.constant 0 : index
      %c0_58 = arith.constant 0 : index
      %116 = vector.load %arg9[%c0_57, %c0_58] : memref<2x1xf32, #tpu.memory_space<vmem>>, vector<2x1xf32>
      tpu.vector_store %arg9[%c0_57, %c0_58], %115 {strides = array<i32>} : memref<2x1xf32, #tpu.memory_space<vmem>>, vector<2x1xf32>,
    } else {
    }
    return
  }
  func.func @transform_0(%arg0: i32) -> (i32, i32) {
    %c0_i32 = arith.constant 0 : i32
    %c0_i32_0 = arith.constant 0 : i32
    %c0_i32_1 = arith.constant 0 : i32
    return %c0_i32, %c0_i32_0 : i32, i32
  }
  func.func @transform_1(%arg0: i32) -> (i32, i32, i32) {
    %c0_i32 = arith.constant 0 : i32
    %c0_i32_0 = arith.constant 0 : i32
    %c0_i32_1 = arith.constant 0 : i32
    return %arg0, %c0_i32, %c0_i32_0 : i32, i32, i32
  }
  func.func @transform_2(%arg0: i32) -> (i32, i32, i32) {
    %c7_i32 = arith.constant 7 : i32
    %0 = arith.subi %c7_i32, %arg0 : i32
    %c0_i32 = arith.constant 0 : i32
    %c0_i32_0 = arith.constant 0 : i32
    %c0_i32_1 = arith.constant 0 : i32
    return %0, %c0_i32, %c0_i32_0 : i32, i32, i32
  }
  func.func @transform_3(%arg0: i32) -> (i32, i32) {
    %c0_i32 = arith.constant 0 : i32
    %c0_i32_0 = arith.constant 0 : i32
    %c0_i32_1 = arith.constant 0 : i32
    return %c0_i32, %c0_i32_0 : i32, i32
  }
  func.func @transform_4(%arg0: i32) -> (i32, i32) {
    %c0_i32 = arith.constant 0 : i32
    %c0_i32_0 = arith.constant 0 : i32
    %c0_i32_1 = arith.constant 0 : i32
    return %c0_i32, %c0_i32_0 : i32, i32
  }
  func.func @transform_5(%arg0: i32) -> (i32, i32) {
    %c0_i32 = arith.constant 0 : i32
    %c0_i32_0 = arith.constant 0 : i32
    %c0_i32_1 = arith.constant 0 : i32
    return %c0_i32, %c0_i32_0 : i32, i32
  }
  func.func @transform_6(%arg0: i32) -> (i32, i32) {
    %c0_i32 = arith.constant 0 : i32
    %c0_i32_0 = arith.constant 0 : i32
    %c0_i32_1 = arith.constant 0 : i32
    return %c0_i32, %c0_i32_0 : i32, i32
  }
  func.func @transform_7(%arg0: i32) -> (i32, i32) {
    %c0_i32 = arith.constant 0 : i32
    %c0_i32_0 = arith.constant 0 : i32
    %c0_i32_1 = arith.constant 0 : i32
    return %c0_i32, %c0_i32_0 : i32, i32
  }
  func.func @transform_8(%arg0: i32) -> (i32, i32) {
    %c0_i32 = arith.constant 0 : i32
    %c0_i32_0 = arith.constant 0 : i32
    %c0_i32_1 = arith.constant 0 : i32
    return %c0_i32, %c0_i32_0 : i32, i32
  }
}

</mosaic_0001>

<bundles_post_ra>
// kernel: cnn_lstm_forward.2
= control target key start
LH: loop header
LB: loop body
LE: loop exit
PB: predicated region body
PF: predicated region fallthrough
CT: control target
= control target key end

     0   :  { %s855_s15 = smov 0   ;;  %s857_s16 = smov 0   ;;  %s1063_s0 = inlined_call_operand.vmem [shape: f32[2,8,3,256], index: 0, kind: input, shape index: {}]   ;;  %s1064_s1 = inlined_call_operand.vmem [shape: f32[3,1024], index: 1, kind: input, shape index: {}]   ;;  %s1065_s2 = inlined_call_operand.vmem [shape: f32[1,1024], index: 2, kind: input, shape index: {}]   ;;  %s1066_s3 = inlined_call_operand.vmem [shape: bf16[8,2,512], index: 3, kind: output, shape index: {0}]   ;;  %s1067_s4 = inlined_call_operand.vmem [shape: bf16[8,2,512], index: 4, kind: output, shape index: {1}]  }
   0x1   :  { %s859_s17 = smov 0  }
   0x2 LB: > { %s758_s18 = sadd.s32 4294967295, %s827_s17   ;;  %s872_s19 = sadd.s32 1, %s827_s17   ;;  %s827_s17 = sphi %s859_s17, %s1071_s17   ;;  %s823_s16 = sphi %s857_s16, %s1070_s16   ;;  %s819_s15 = sphi %s855_s15, %s1069_s15  }
   0x3   : > { %s19_s20 = ssub.s32 %s827_s17, %s872_s19  ;;  %s22_s21 = sadd.s32 1, %s823_s16 }
   0x4   : > { %p20_p0 = scmp.eq.s32.totalorder %s19_s20, 0  ;;  %p29_p1 = scmp.ne.s32.totalorder %s823_s16, %s819_s15 }
   0x5   : > { %p30_p2 = scmp.eq.s32.totalorder %s827_s17, 0  ;;  %p761_p4 = scmp.ge.s32.totalorder %s827_s17, 8 }
   0x6   : > { %s881_s22 = scalar_select %p20_p0, %s823_s16, %s22_s21  }
   0x7   : > { %p31_p3 = por %p30_p2, %p29_p1  ;;  %155 = sbr.rel (%p761_p4) target bundleno = 21 (0x15), region = 24 }
   0xe   : > { %158 = sbr.rel (!%p31_p3) target bundleno = 21 (0x15), region = 28  ;;  %s160_s23 = sand.u32 (%p31_p3), 1, %s823_s16  }
   0xf   : > { %s779_s24 = sshll.u32 (%p31_p3), %s827_s17, 3  ;;  %s762_s25 = sshll.u32 (%p31_p3), %s160_s23, 4 }
  0x10   : > { %s165_s28 = scalar_lea.vmem (%p31_p3), %s1063_s0, %s779_s24  ;;  %s162_s29 = scalar_lea.vmem (%p31_p3), [#allocation2], %s762_s25 }
  0x11   : > { %v195_v0 = vld [vmem:[%s165_s28] sm:$0xff] (%p31_p3) }
  0x12   : > { %v197_v1 = vld [vmem:[%s165_s28 + $0x40] sm:$0xff] (%p31_p3)  ;;  %196 = vst [vmem:[%s162_s29] sm:$0xff] (%p31_p3), %v195_v0 }
  0x13   : > { %198 = vst [vmem:[%s162_s29 + $0x8] sm:$0xff] (%p31_p3), %v197_v1 }
  0x15 PF: > { %p765_p5 = scmp.ge.s32.totalorder %s827_s17, 1  ;;  %p203_p6 = scmp.lt.s32.totalorder %s827_s17, 9 }
  0x17   : > { %p204_p7 = pnand %p765_p5, %p203_p6 }
  0x18   : > { %s210_s30 = sand.u32 (!%p204_p7), 1, %s819_s15   ;;  %v250_v2 = vlaneseq (!%p204_p7)  ;;  %vm344_vm0 = vcmask (!%p204_p7), 1042434   ;;  %vm349_vm1 = vcmask (!%p204_p7), 1042433   ;;  %vm455_vm2 = vcmask (!%p204_p7), 1043459   ;;  %v769_v40 = vld [vmem:[%s1064_s1 + $0x1] ss:$4 sm:$0xff] (!%p204_p7) }
  0x19   : > { %207 = sbr.rel (%p204_p7) target bundleno = 205 (0xcd), region = 66  ;;  %s766_s5 = sshll.u32 (!%p204_p7), %s210_s30, 4  ;;  %vm460_vm3 = vcmask (!%p204_p7), 1043458   ;;  %vm266_vm4 = vcmask (!%p204_p7), 1041409   ;;  %vm271_vm5 = vcmask (!%p204_p7), 1041408   ;;  %v974_v63 = vld [vmem:[%s1065_s2] sm:$0xff] (!%p204_p7) }
  0x1a   : > { %v892_v3 = vshrl.u32 (!%p204_p7), %v250_v2, 7  ;;  %s212_s6 = scalar_lea.vmem (!%p204_p7), [#allocation2], %s766_s5  ;;  %v770_v42 = vld [vmem:[%s1064_s1 + $0x2] ss:$4 sm:$0xff] (!%p204_p7)  ;;  %v956_v48 = vld [vmem:[%s1064_s1] ss:$4 sm:$0xff] (!%p204_p7) }
  0x1b   : > { %v246_v4 = vld [vmem:[%s212_s6] sm:$0x77] (!%p204_p7)  ;;  %v247_v5 = vld [vmem:[%s212_s6 + $0x8] sm:$0x77] (!%p204_p7)  ;;  %v829_v49 = vmov (!%p204_p7), 1966171168  }
  0x1c   : > { %v895_v6 = vsub.s32 (!%p204_p7), 1, %v892_v3  ;;  %v898_v7 = vsub.s32 (!%p204_p7), 5, %v892_v3  ;;  %v901_v8 = vsub.s32 (!%p204_p7), 2, %v892_v3  ;;  %v904_v9 = vsub.s32 (!%p204_p7), 6, %v892_v3  ;;  %p1011_p8 = scmp.lt.s32.totalorder (!%p204_p7), %s758_s18, 7 }
  0x1d   : > { %v907_v10 = vsub.s32 (!%p204_p7), 0, %v892_v3  ;;  %v910_v11 = vsub.s32 (!%p204_p7), 4, %v892_v3  ;;  %v937_v39 = vsub.s32 (!%p204_p7), 3, %v892_v3  ;;  %v943_v41 = vsub.s32 (!%p204_p7), 7, %v892_v3 }
  0x1e   : > { %v331_v12 = vrot.slane (!%p204_p7), %v246_v4, %v895_v6  ;;  %v335_v13 = vrot.slane (!%p204_p7), %v246_v4, %v898_v7  ;;  %v339_v14 = vrot.slane (!%p204_p7), %v247_v5, %v895_v6  ;;  %v343_v15 = vrot.slane (!%p204_p7), %v247_v5, %v898_v7 }
  0x1f   : > { %v442_v16 = vrot.slane (!%p204_p7), %v246_v4, %v901_v8  ;;  %v446_v17 = vrot.slane (!%p204_p7), %v246_v4, %v904_v9  ;;  %v450_v18 = vrot.slane (!%p204_p7), %v247_v5, %v901_v8  ;;  %v454_v19 = vrot.slane (!%p204_p7), %v247_v5, %v904_v9 }
  0x20   : > { %v345_v20 = vsel %vm344_vm0, %v339_v14, %v331_v12  ;;  %v346_v21 = vsel %vm344_vm0, %v343_v15, %v335_v13  ;;  %v253_v22 = vrot.slane %v246_v4, %v907_v10  ;;  %v257_v23 = vrot.slane %v246_v4, %v910_v11  ;;  %s1073_s18 = smov (!%p1011_p8, %s758_s18), 7 }
  0x21   : > { %v350_v24 = vsel %vm349_vm1, %v345_v20, 0.0  ;;  %v351_v25 = vsel %vm349_vm1, %v346_v21, 0.0  ;;  %v456_v26 = vsel %vm455_vm2, %v450_v18, %v442_v16  ;;  %v457_v27 = vsel %vm455_vm2, %v454_v19, %v446_v17  ;;  %s767_s17 = sshll.u32 %s1073_s18, 2 }
  0x22   : > { %v352_v28 = vadd.f32 %v351_v25, %v350_v24  ;;  %v461_v29 = vsel %vm460_vm3, %v456_v26, 0.0  ;;  %v462_v30 = vsel %vm460_vm3, %v457_v27, 0.0  ;;  %v261_v31 = vrot.slane %v247_v5, %v907_v10  ;;  %s241_s23 = scalar_lea.vmem %s1066_s3, %s767_s17  ;;  %s245_s18 = scalar_lea.vmem %s1067_s4, %s767_s17 }
  0x23   : > { %v463_v32 = vadd.f32 %v462_v30, %v461_v29  ;;  %v265_v33 = vrot.slane %v247_v5, %v910_v11  ;;  %v362_v43 = vrot.slane %v769_v40, %v907_v10  ;;  %v366_v44 = vrot.slane %v769_v40, %v895_v6 }
  0x24   : > { %353 = vadd.xlane.f32.xlu0 %v352_v28  ;;  %v267_v34 = vsel %vm266_vm4, %v261_v31, %v253_v22  ;;  %v370_v45 = vrot.slane %v769_v40, %v901_v8  ;;  %v374_v46 = vrot.slane %v769_v40, %v937_v39  ;;  %v378_v47 = vrot.slane %v769_v40, %v910_v11 }
  0x25   : > { %464 = vadd.xlane.f32.xlu1 %v463_v32  ;;  %v268_v35 = vsel %vm266_vm4, %v265_v33, %v257_v23  ;;  %v272_v36 = vsel %vm271_vm5, %v267_v34, 0.0  ;;  %v611_v50 = vunpack.c.l.s4 %v829_v49  ;;  %v382_v51 = vrot.slane %v769_v40, %v898_v7 }
  0x26   : > { %v273_v37 = vsel %vm271_vm5, %v268_v35, 0.0  ;;  %v386_v52 = vrot.slane %v769_v40, %v904_v9  ;;  %v390_v53 = vrot.slane %v769_v40, %v943_v41  ;;  %v473_v54 = vrot.slane %v770_v42, %v907_v10 }
  0x27   : > { %v274_v38 = vadd.f32 %v273_v37, %v272_v36  ;;  %v477_v55 = vrot.slane %v770_v42, %v895_v6  ;;  %v481_v56 = vrot.slane %v770_v42, %v901_v8  ;;  %v485_v57 = vrot.slane %v770_v42, %v937_v39 }
  0x28   : > { %v489_v58 = vrot.slane %v770_v42, %v910_v11  ;;  %v493_v59 = vrot.slane %v770_v42, %v898_v7  ;;  %v497_v60 = vrot.slane %v770_v42, %v904_v9  ;;  %v501_v61 = vrot.slane %v770_v42, %v943_v41 }
  0x29   : > { %275 = vadd.xlane.f32.xlu0 %v274_v38  ;;  %v283_v62 = vrot.slane %v956_v48, %v907_v10  ;;  %v287_v1 = vrot.slane %v956_v48, %v895_v6  ;;  %v291_v2 = vrot.slane %v956_v48, %v901_v8  ;;  %v295_v4 = vrot.slane %v956_v48, %v937_v39 }
  0x2a   : > { %v612_v5 = vunpack.c.0.s8 %v611_v50  ;;  %v299_v14 = vrot.slane %v956_v48, %v910_v11  ;;  %v303_v15 = vrot.slane %v956_v48, %v898_v7  ;;  %v307_v16 = vrot.slane %v956_v48, %v904_v9 }
  0x2b   : > { %v311_v17 = vrot.slane %v956_v48, %v943_v41  ;;  %v555_v18 = vrot.slane %v974_v63, %v907_v10  ;;  %v559_v19 = vrot.slane %v974_v63, %v895_v6  ;;  %v563_v20 = vrot.slane %v974_v63, %v901_v8 }
  0x2c   : > { %v567_v23 = vrot.slane %v974_v63, %v937_v39  ;;  %v571_v24 = vrot.slane %v974_v63, %v910_v11  ;;  %v575_v25 = vrot.slane %v974_v63, %v898_v7  ;;  %v579_v26 = vrot.slane %v974_v63, %v904_v9 }
  0x2d   : > { %v583_v27 = vrot.slane %v974_v63, %v943_v41  ;;  %v1007_v28 = vsub.s32 %v612_v5, %v892_v3 }
  0xb1   : > { %v354_v0 = vpop.xlane.xlu0 %353 }
  0xb2   : > { %v355_v12 = vmul.f32 0.00390625, %v354_v0  ;;  %v465_v13 = vpop.xlane.xlu1 %464 }
  0xb3   : > { %v466_v22 = vmul.f32 0.00390625, %v465_v13 }
  0xb4   : > { %v399_v21 = vmul.f32 %v362_v43, %v355_v12  ;;  %v400_v29 = vmul.f32 %v366_v44, %v355_v12  ;;  %v401_v30 = vmul.f32 %v370_v45, %v355_v12  ;;  %v402_v31 = vmul.f32 %v374_v46, %v355_v12 }
  0xb5   : > { %v403_v32 = vmul.f32 %v378_v47, %v355_v12  ;;  %v404_v33 = vmul.f32 %v382_v51, %v355_v12  ;;  %v405_v34 = vmul.f32 %v386_v52, %v355_v12  ;;  %v406_v35 = vmul.f32 %v390_v53, %v355_v12 }
  0xb6   : > { %v415_v36 = vrot.slane %v399_v21, 1  ;;  %v510_v37 = vmul.f32 %v473_v54, %v466_v22  ;;  %v511_v38 = vmul.f32 %v477_v55, %v466_v22  ;;  %v512_v40 = vmul.f32 %v481_v56, %v466_v22  ;;  %v276_v0 = vpop.xlane.xlu0 %275 }
  0xb7   : > { %v513_v42 = vmul.f32 %v485_v57, %v466_v22  ;;  %v514_v43 = vmul.f32 %v489_v58, %v466_v22  ;;  %v515_v48 = vmul.f32 %v493_v59, %v466_v22  ;;  %v516_v49 = vmul.f32 %v497_v60, %v466_v22 }
  0xb8   : > { %v517_v50 = vmul.f32 %v501_v61, %v466_v22  ;;  %v416_v13 = vrot.slane %v400_v29, 1  ;;  %v417_v3 = vrot.slane %v401_v30, 1  ;;  %v418_v44 = vrot.slane %v402_v31, 1 }
  0xb9   : > { %v419_v45 = vrot.slane %v403_v32, 1  ;;  %v420_v46 = vrot.slane %v404_v33, 1  ;;  %v421_v47 = vrot.slane %v405_v34, 1  ;;  %v422_v51 = vrot.slane %v406_v35, 1 }
  0xba   : > { %v526_v52 = vrot.slane %v510_v37, 2  ;;  %v527_v53 = vrot.slane %v511_v38, 2  ;;  %v528_v5 = vrot.slane %v512_v40, 2  ;;  %v529_v54 = vrot.slane %v513_v42, 2 }
  0xbb   : > { %v277_v55 = vmul.f32 0.00390625, %v276_v0  ;;  %v530_v56 = vrot.slane %v514_v43, 2  ;;  %v531_v57 = vrot.slane %v515_v48, 2  ;;  %v532_v58 = vrot.slane %v516_v49, 2 }
  0xbc   : > { %v533_v59 = vrot.slane %v517_v50, 2 }
  0xbd   : > { %v320_v60 = vmul.f32 %v283_v62, %v277_v55  ;;  %v321_v61 = vmul.f32 %v287_v1, %v277_v55  ;;  %v322_v12 = vmul.f32 %v291_v2, %v277_v55  ;;  %v323_v21 = vmul.f32 %v295_v4, %v277_v55 }
  0xbe   : > { %v324_v22 = vmul.f32 %v299_v14, %v277_v55  ;;  %v325_v29 = vmul.f32 %v303_v15, %v277_v55  ;;  %v326_v30 = vmul.f32 %v307_v16, %v277_v55  ;;  %v327_v31 = vmul.f32 %v311_v17, %v277_v55 }
  0xbf   : > { %v431_v32 = vadd.f32 %v415_v36, %v320_v60  ;;  %v432_v33 = vadd.f32 %v416_v13, %v321_v61  ;;  %v433_v34 = vadd.f32 %v417_v3, %v322_v12  ;;  %v434_v35 = vadd.f32 %v418_v44, %v323_v21 }
  0xc0   : > { %v435_v37 = vadd.f32 %v419_v45, %v324_v22  ;;  %v436_v38 = vadd.f32 %v420_v46, %v325_v29  ;;  %v437_v40 = vadd.f32 %v421_v47, %v326_v30  ;;  %v438_v42 = vadd.f32 %v422_v51, %v327_v31 }
  0xc1   : > { %v542_v62 = vadd.f32 %v526_v52, %v431_v32  ;;  %v543_v43 = vadd.f32 %v527_v53, %v432_v33  ;;  %v544_v1 = vadd.f32 %v528_v5, %v433_v34  ;;  %v545_v2 = vadd.f32 %v529_v54, %v434_v35 }
  0xc2   : > { %v546_v4 = vadd.f32 %v530_v56, %v435_v37  ;;  %v547_v14 = vadd.f32 %v531_v57, %v436_v38  ;;  %v548_v15 = vadd.f32 %v532_v58, %v437_v40  ;;  %v549_v16 = vadd.f32 %v533_v59, %v438_v42 }
  0xc3   : > { %v592_v17 = vadd.f32 %v555_v18, %v542_v62  ;;  %v593_v36 = vadd.f32 %v559_v19, %v543_v43  ;;  %v594_v48 = vadd.f32 %v563_v20, %v544_v1  ;;  %v595_v49 = vadd.f32 %v567_v23, %v545_v2 }
  0xc4   : > { %v596_v50 = vadd.f32 %v571_v24, %v546_v4  ;;  %v597_v10 = vadd.f32 %v575_v25, %v547_v14  ;;  %v598_v6 = vadd.f32 %v579_v26, %v548_v15  ;;  %v599_v8 = vadd.f32 %v583_v27, %v549_v16 }
  0xc5   : > { %v771_v18 = vpack.c.bf16 %v593_v36, %v592_v17  ;;  %v772_v39 = vpack.c.bf16 %v595_v49, %v594_v48 }
  0xc6   : > { %v774_v19 = vpack.c.bf16 %v597_v10, %v596_v50  ;;  %v775_v20 = vpack.c.bf16 %v599_v8, %v598_v6 }
  0xc7   : > { %v616_v11 = vrot.slane %v771_v18, %v1007_v28  ;;  %v623_v23 = vrot.slane %v772_v39, %v1007_v28 }
  0xc8   : > { %v650_v7 = vrot.slane %v774_v19, %v1007_v28  ;;  %v657_v9 = vrot.slane %v775_v20, %v1007_v28 }
  0xc9   : > { %v624_v41 = vcombine.low %v616_v11, %v623_v23 }
  0xca   : > { %v658_v63 = vcombine.low %v650_v7, %v657_v9 }
  0xcb   : > { %773 = vst.sshfl [vmem:[%s241_s23] sm:$0x55 pattern:$0x73625140] %v624_v41 }
  0xcc   : > { %776 = vst.sshfl [vmem:[%s245_s18] sm:$0x55 pattern:$0x73625140] %v658_v63 }
  0xcd PF: > { %p12_p9 = scmp.ge.s32.totalorder %s872_s19, 10   ;;  %s1069_s15 = smov %s823_s16 }
  0xce   : > { %s1070_s16 = smov %s881_s22  ;;  %s1071_s17 = smov %s872_s19 }
  0xcf   :  { %14 = sbr.rel (!%p12_p9) target bundleno = 2 (0x2), region = 119 }

// kernel: cnn_lstm_forward.3
= control target key start
LH: loop header
LB: loop body
LE: loop exit
PB: predicated region body
PF: predicated region fallthrough
CT: control target
= control target key end

     0   :  { %s1377_s29 = smov 0   ;;  %s1636_s0 = inlined_call_operand.vmem [shape: s32[2,1], index: 0, kind: input, shape index: {}]   ;;  %s1637_s1 = inlined_call_operand.vmem [shape: bf16[8,2,512], index: 1, kind: input, shape index: {}]   ;;  %s1638_s2 = inlined_call_operand.vmem [shape: bf16[8,2,512], index: 2, kind: input, shape index: {}]   ;;  %s1639_s3 = inlined_call_operand.vmem [shape: bf16[128,512], index: 3, kind: input, shape index: {}]   ;;  %s1640_s4 = inlined_call_operand.vmem [shape: bf16[128,512], index: 4, kind: input, shape index: {}]   ;;  %s1641_s5 = inlined_call_operand.vmem [shape: f32[1,128], index: 5, kind: input, shape index: {}]   ;;  %s1642_s6 = inlined_call_operand.vmem [shape: f32[1,128], index: 6, kind: input, shape index: {}]   ;;  %s1643_s7 = inlined_call_operand.<no memory space> [shape: f32[1,1], index: 7, kind: input, shape index: {}]   ;;  %s1644_s8 = inlined_call_operand.vmem [shape: f32[2,1], index: 8, kind: output, shape index: {}]  }
   0x1   :  { %v13_v0 = vstv %s1643_s7 }
   0x2   :  { %14 = vst [vmem:[#allocation6] sm:$0x1] %v13_v0 }
   0x3 LB: > { %s1383_s30 = sadd.s32 4294967295, %s1324_s29   ;;  %p1098_p0 = scmp.ge.s32.totalorder %s1324_s29, 1  ;;  %s1324_s29 = sphi %s1377_s29, %s20_s29  }
   0x4   : > { %p271_p1 = scmp.lt.s32.totalorder %s1324_s29, 9 }
   0x6   : > { %p272_p2 = pnand %p1098_p0, %p271_p1 }
   0x7   : > { %p304_p3 = scmp.lt.s32.totalorder (!%p272_p2), %s1383_s30, 7  ;;  %s1389_s7 = ssub.s32 (!%p272_p2), 7, %s1383_s30 }
   0x8   : > { %275 = sbr.rel (%p272_p2) target bundleno = 516 (0x204), region = 52  ;;  %p309_p4 = scmp.lt.s32.totalorder (!%p272_p2), %s1389_s7, 7 }
   0x9   : > { %p1101_p5 = scmp.ne.s32.totalorder (!%p272_p2), %s1383_s30, 0 }
   0xf   : > { %s305_s9 = scalar_select %p304_p3, %s1383_s30, 7 }
  0x10   : > { %s310_s10 = scalar_select %p309_p4, %s1389_s7, 7 }
  0x11   : > { %s1099_s11 = sshll.u32 %s305_s9, 2  ;;  %318 = sbr.rel (%p1101_p5) target bundleno = 24 (0x18), region = 56  ;;  %v1326_v1 = vmov (!%p1101_p5), 0.0  }
  0x12   : > { %s1397_s14 = scalar_lea.vmem %s1637_s1, %s1099_s11  ;;  %s1100_s15 = sshll.u32 %s310_s10, 2  ;;  %319 = vst [vmem:[#allocation2] sm:$0x3] (!%p1101_p5), %v1326_v1  ;;  %320 = vst [vmem:[#allocation3] sm:$0x3] (!%p1101_p5), %v1326_v1 }
  0x13   : > { %s1402_s18 = scalar_lea.vmem %s1638_s2, %s1100_s15  ;;  %321 = vst [vmem:[#allocation4] sm:$0x3] (!%p1101_p5), %v1326_v1  ;;  %322 = vst [vmem:[#allocation5] sm:$0x3] (!%p1101_p5), %v1326_v1 }
  0x18 PF: > { %v1190_v2 = vld [vmem:[%s1639_s3 + $0x4] ss:$16 sps:$4 sm:$0xff]   ;;  %v1192_v3 = vld [vmem:[%s1639_s3 + $0xc] ss:$16 sps:$4 sm:$0xff]   ;;  %v1327_v4 = vmov 0   ;;  %v657_v49 = vstv %s1383_s30  ;;  %v1003_v52 = vstv %s1389_s7  ;;  %p1172_p6 = scmp.ne.s32.totalorder %s1383_s30, 7 }
  0x19   : > { %553 = vmatprep.mubr.bf16.mxu0 %v1327_v4  ;;  %594 = vmatprep.mubr.bf16.mxu1 %v1327_v4  ;;  %v1194_v5 = vld [vmem:[%s1639_s3] ss:$16 sps:$4 sm:$0xff]   ;;  %v1195_v6 = vld [vmem:[%s1639_s3 + $0x8] ss:$16 sps:$4 sm:$0xff]   ;;  %v1196_v7 = vld [vmem:[%s1639_s3 + $0x24] ss:$16 sps:$4 sm:$0xff]  }
  0x1a   : > { %521 = vmatprep.subr.bf16.mxu0 %v1190_v2  ;;  %1189 = vset.pattern.permute.xlu0 %v1327_v4  ;;  %v1198_v8 = vld [vmem:[%s1639_s3 + $0x2c] ss:$16 sps:$4 sm:$0xff]   ;;  %v1200_v9 = vld [vmem:[%s1639_s3 + $0x20] ss:$16 sps:$4 sm:$0xff]   ;;  %v1201_v10 = vld [vmem:[%s1639_s3 + $0x28] ss:$16 sps:$4 sm:$0xff]  }
  0x1b   : > { %562 = vmatprep.subr.bf16.mxu1 %v1192_v3  ;;  %522 = vmatpush1.bf16.msra.mxu0 %v1194_v5  ;;  %v1202_v11 = vld [vmem:[%s1639_s3 + $0x44] ss:$16 sps:$4 sm:$0xff]   ;;  %v1204_v12 = vld [vmem:[%s1639_s3 + $0x4c] ss:$16 sps:$4 sm:$0xff]   ;;  %v1206_v13 = vld [vmem:[%s1639_s3 + $0x40] ss:$16 sps:$4 sm:$0xff]  }
  0x1c   : > { %563 = vmatpush1.bf16.msra.mxu1 %v1195_v6  ;;  %523 = vmatprep.subr.bf16.mxu0 %v1196_v7  ;;  %v1207_v14 = vld [vmem:[%s1639_s3 + $0x48] ss:$16 sps:$4 sm:$0xff]   ;;  %v1208_v15 = vld [vmem:[%s1639_s3 + $0x64] ss:$16 sps:$4 sm:$0xff]   ;;  %v1210_v16 = vld [vmem:[%s1639_s3 + $0x6c] ss:$16 sps:$4 sm:$0xff]  }
  0x1d   : > { %564 = vmatprep.subr.bf16.mxu1 %v1198_v8  ;;  %v1212_v17 = vld [vmem:[%s1639_s3 + $0x60] ss:$16 sps:$4 sm:$0xff]   ;;  %v1213_v18 = vld [vmem:[%s1639_s3 + $0x68] ss:$16 sps:$4 sm:$0xff]   ;;  %v1214_v19 = vld [vmem:[%s1639_s3 + $0x84] ss:$16 sps:$4 sm:$0xff]  }
  0x1e   : > { %v1216_v20 = vld [vmem:[%s1639_s3 + $0x8c] ss:$16 sps:$4 sm:$0xff]   ;;  %v1218_v21 = vld [vmem:[%s1639_s3 + $0x80] ss:$16 sps:$4 sm:$0xff]   ;;  %v1219_v22 = vld [vmem:[%s1639_s3 + $0x88] ss:$16 sps:$4 sm:$0xff]  }
  0x1f   : > { %524 = vmatpush1.bf16.msra.mxu0 %v1200_v9  ;;  %v1220_v23 = vld [vmem:[%s1639_s3 + $0xa4] ss:$16 sps:$4 sm:$0xff]   ;;  %v1222_v24 = vld [vmem:[%s1639_s3 + $0xac] ss:$16 sps:$4 sm:$0xff]   ;;  %v1224_v25 = vld [vmem:[%s1639_s3 + $0xa0] ss:$16 sps:$4 sm:$0xff]  }
  0x20   : > { %565 = vmatpush1.bf16.msra.mxu1 %v1201_v10  ;;  %525 = vmatprep.subr.bf16.mxu0 %v1202_v11  ;;  %v1225_v26 = vld [vmem:[%s1639_s3 + $0xa8] ss:$16 sps:$4 sm:$0xff]   ;;  %v1226_v27 = vld [vmem:[%s1639_s3 + $0xc4] ss:$16 sps:$4 sm:$0xff]   ;;  %v1228_v28 = vld [vmem:[%s1639_s3 + $0xcc] ss:$16 sps:$4 sm:$0xff]  }
  0x21   : > { %566 = vmatprep.subr.bf16.mxu1 %v1204_v12  ;;  %v1230_v29 = vld [vmem:[%s1639_s3 + $0xc0] ss:$16 sps:$4 sm:$0xff]   ;;  %v1231_v30 = vld [vmem:[%s1639_s3 + $0xc8] ss:$16 sps:$4 sm:$0xff]   ;;  %v1232_v31 = vld [vmem:[%s1639_s3 + $0xe4] ss:$16 sps:$4 sm:$0xff]  }
  0x22   : > { %v1234_v32 = vld [vmem:[%s1639_s3 + $0xec] ss:$16 sps:$4 sm:$0xff]   ;;  %v1236_v33 = vld [vmem:[%s1639_s3 + $0xe0] ss:$16 sps:$4 sm:$0xff]   ;;  %v1237_v34 = vld [vmem:[%s1639_s3 + $0xe8] ss:$16 sps:$4 sm:$0xff]  }
  0x23   : > { %526 = vmatpush1.bf16.msra.mxu0 %v1206_v13  ;;  %v1504_v35 = vld [vmem:[#allocation2] sm:$0x3]  ;;  %v1240_v36 = vld [vmem:[%s1640_s4 + $0x4] ss:$16 sps:$4 sm:$0xff]   ;;  %v1243_v37 = vld [vmem:[%s1640_s4 + $0xc] ss:$16 sps:$4 sm:$0xff]  }
  0x24   : > { %567 = vmatpush1.bf16.msra.mxu1 %v1207_v14  ;;  %527 = vmatprep.subr.bf16.mxu0 %v1208_v15  ;;  %v328_v38 = vpack.c.bf16 %v1504_v35, %v1504_v35  ;;  %v1238_v39 = vld [vmem:[%s1640_s4] ss:$16 sps:$4 sm:$0xff]   ;;  %v1241_v40 = vld [vmem:[%s1640_s4 + $0x8] ss:$16 sps:$4 sm:$0xff]   ;;  %v1246_v41 = vld [vmem:[%s1640_s4 + $0x24] ss:$16 sps:$4 sm:$0xff]   ;;  %v612_v14 = vlaneseq }
  0x25   : > { %568 = vmatprep.subr.bf16.mxu1 %v1210_v16  ;;  %v1249_v42 = vld [vmem:[%s1640_s4 + $0x2c] ss:$16 sps:$4 sm:$0xff]   ;;  %v1244_v43 = vld [vmem:[%s1640_s4 + $0x20] ss:$16 sps:$4 sm:$0xff]   ;;  %v1247_v44 = vld [vmem:[%s1640_s4 + $0x28] ss:$16 sps:$4 sm:$0xff]  }
  0x26   : > { %v1252_v45 = vld [vmem:[%s1640_s4 + $0x44] ss:$16 sps:$4 sm:$0xff]   ;;  %v1255_v46 = vld [vmem:[%s1640_s4 + $0x4c] ss:$16 sps:$4 sm:$0xff]   ;;  %v1250_v47 = vld [vmem:[%s1640_s4 + $0x40] ss:$16 sps:$4 sm:$0xff]  }
  0x27   : > { %528 = vmatpush1.bf16.msra.mxu0 %v1212_v17  ;;  %v1253_v48 = vld [vmem:[%s1640_s4 + $0x48] ss:$16 sps:$4 sm:$0xff]   ;;  %v1258_v50 = vld [vmem:[%s1640_s4 + $0x64] ss:$16 sps:$4 sm:$0xff]   ;;  %v1261_v51 = vld [vmem:[%s1640_s4 + $0x6c] ss:$16 sps:$4 sm:$0xff]  }
  0x28   : > { %569 = vmatpush1.bf16.msra.mxu1 %v1213_v18  ;;  %529 = vmatprep.subr.bf16.mxu0 %v1214_v19  ;;  %v323_v53 = vld [vmem:[%s1636_s0] sm:$0x3]  ;;  %v1259_v55 = vld [vmem:[%s1640_s4 + $0x68] ss:$16 sps:$4 sm:$0xff]   ;;  %v1264_v56 = vld [vmem:[%s1640_s4 + $0x84] ss:$16 sps:$4 sm:$0xff]  }
  0x29   : > { %570 = vmatprep.subr.bf16.mxu1 %v1216_v20  ;;  %v1256_v54 = vld [vmem:[%s1640_s4 + $0x60] ss:$16 sps:$4 sm:$0xff]   ;;  %vm658_vm0 = vcmp.lt.s32.totalorder %v657_v49, %v323_v53  ;;  %vm1004_vm1 = vcmp.lt.s32.totalorder %v1003_v52, %v323_v53  ;;  %v1267_v57 = vld [vmem:[%s1640_s4 + $0x8c] ss:$16 sps:$4 sm:$0xff]   ;;  %v1265_v61 = vld [vmem:[%s1640_s4 + $0x88] ss:$16 sps:$4 sm:$0xff]  }
  0x2a   : > { %v659_v58 = vsel %vm658_vm0, 1, %v1327_v4  ;;  %v1005_v59 = vsel %vm1004_vm1, 1, %v1327_v4  ;;  %v1262_v60 = vld [vmem:[%s1640_s4 + $0x80] ss:$16 sps:$4 sm:$0xff]   ;;  %v1270_v62 = vld [vmem:[%s1640_s4 + $0xa4] ss:$16 sps:$4 sm:$0xff]  }
  0x2b   : > { %530 = vmatpush1.bf16.msra.mxu0 %v1218_v21  ;;  %661 = vperm.xlu0 %1189, %v659_v58   ;;  %v1273_v63 = vld [vmem:[%s1640_s4 + $0xac] ss:$16 sps:$4 sm:$0xff]   ;;  %v1268_v0 = vld [vmem:[%s1640_s4 + $0xa0] ss:$16 sps:$4 sm:$0xff]   ;;  %v1271_v1 = vld [vmem:[%s1640_s4 + $0xa8] ss:$16 sps:$4 sm:$0xff]  }
  0x2c   : > { %571 = vmatpush1.bf16.msra.mxu1 %v1219_v22  ;;  %531 = vmatprep.subr.bf16.mxu0 %v1220_v23  ;;  %v1276_v2 = vld [vmem:[%s1640_s4 + $0xc4] ss:$16 sps:$4 sm:$0xff]   ;;  %v1279_v3 = vld [vmem:[%s1640_s4 + $0xcc] ss:$16 sps:$4 sm:$0xff]   ;;  %v1277_v5 = vld [vmem:[%s1640_s4 + $0xc8] ss:$16 sps:$4 sm:$0xff]  }
  0x2d   : > { %572 = vmatprep.subr.bf16.mxu1 %v1222_v24  ;;  %v1282_v6 = vld [vmem:[%s1640_s4 + $0xe4] ss:$16 sps:$4 sm:$0xff]   ;;  %v1285_v7 = vld [vmem:[%s1640_s4 + $0xec] ss:$16 sps:$4 sm:$0xff]   ;;  %v1280_v8 = vld [vmem:[%s1640_s4 + $0xe0] ss:$16 sps:$4 sm:$0xff]  }
  0x2e   : > { %v1283_v9 = vld [vmem:[%s1640_s4 + $0xe8] ss:$16 sps:$4 sm:$0xff]   ;;  %v1613_v10 = vld [vmem:[#allocation4] sm:$0x3]  ;;  %v1328_v12 = vmov 1983009808  }
  0x2f   : > { %532 = vmatpush1.bf16.msra.mxu0 %v1224_v25  ;;  %1007 = vperm.xlu0 %1189, %v1005_v59   ;;  %v673_v11 = vpack.c.bf16 %v1613_v10, %v1613_v10  ;;  %v610_v13 = vunpack.c.l.s4 %v1328_v12  ;;  %v613_v16 = vshrl.u32 %v612_v14, 7  ;;  %v324_v21 = vld [vmem:[%s1397_s14] sm:$0xf]  ;;  %vm1028_vm4 = vcmask (!%p1172_p6), 1041408  }
  0x30   : > { %573 = vmatpush1.bf16.msra.mxu1 %v1225_v26  ;;  %533 = vmatprep.subr.bf16.mxu0 %v1226_v27  ;;  %v326_v58 = vld [vmem:[#allocation3] sm:$0x3]  ;;  %vm1053_vm5 = vcmask (!%p1172_p6), 1024  }
  0x31   : > { %574 = vmatprep.subr.bf16.mxu1 %v1228_v28  ;;  %v611_v15 = vunpack.c.0.s8 %v610_v13 }
  0x33   : > { %534 = vmatpush1.bf16.msra.mxu0 %v1230_v29  ;;  %v614_v19 = vsub.s32 %v611_v15, %v613_v16 }
  0x34   : > { %575 = vmatpush1.bf16.msra.mxu1 %v1231_v30  ;;  %535 = vmatprep.subr.bf16.mxu0 %v1232_v31  ;;  %v327_v30 = vunpack.c.l.bf16 %v324_v21 }
  0x35   : > { %576 = vmatprep.subr.bf16.mxu1 %v1234_v32 }
  0x37   : > { %536 = vmatpush1.bf16.msra.mxu0 %v1236_v33 }
  0x38   : > { %577 = vmatpush1.bf16.msra.mxu1 %v1237_v34  ;;  %866 = vmatprep.subr.bf16.mxu0 %v1240_v36 }
  0x39   : > { %907 = vmatprep.subr.bf16.mxu1 %v1243_v37 }
  0x3a   : > { %554 = vmatmul.mubr.bf16.vlgmr.msra.gmra.mrb[0].mxu0 %v328_v38 }
  0x3b   : > { %595 = vmatmul.mubr.bf16.vlgmr.msra.gmra.mrb[0].mxu1 %v328_v38  ;;  %867 = vmatpush1.bf16.msra.mxu0 %v1238_v39 }
  0x3c   : > { %908 = vmatpush1.bf16.msra.mxu1 %v1241_v40  ;;  %868 = vmatprep.subr.bf16.mxu0 %v1246_v41 }
  0x3d   : > { %909 = vmatprep.subr.bf16.mxu1 %v1249_v42  ;;  %898 = vmatprep.mubr.bf16.mxu0 %v1327_v4 }
  0x3e   : > { %939 = vmatprep.mubr.bf16.mxu1 %v1327_v4  ;;  %v1274_v4 = vld [vmem:[%s1640_s4 + $0xc0] ss:$16 sps:$4 sm:$0xff]  }
  0x3f   : > { %869 = vmatpush1.bf16.msra.mxu0 %v1244_v43 }
  0x40   : > { %910 = vmatpush1.bf16.msra.mxu1 %v1247_v44  ;;  %870 = vmatprep.subr.bf16.mxu0 %v1252_v45 }
  0x41   : > { %911 = vmatprep.subr.bf16.mxu1 %v1255_v46 }
  0x43   : > { %871 = vmatpush1.bf16.msra.mxu0 %v1250_v47 }
  0x44   : > { %912 = vmatpush1.bf16.msra.mxu1 %v1253_v48  ;;  %872 = vmatprep.subr.bf16.mxu0 %v1258_v50  ;;  %v669_v48 = vld [vmem:[%s1402_s18] sm:$0xf] }
  0x45   : > { %913 = vmatprep.subr.bf16.mxu1 %v1261_v51 }
  0x47   : > { %873 = vmatpush1.bf16.msra.mxu0 %v1256_v54 }
  0x48   : > { %914 = vmatpush1.bf16.msra.mxu1 %v1259_v55  ;;  %874 = vmatprep.subr.bf16.mxu0 %v1264_v56 }
  0x49   : > { %915 = vmatprep.subr.bf16.mxu1 %v1267_v57 }
  0x4b   : > { %875 = vmatpush1.bf16.msra.mxu0 %v1262_v60 }
  0x4c   : > { %916 = vmatpush1.bf16.msra.mxu1 %v1265_v61  ;;  %876 = vmatprep.subr.bf16.mxu0 %v1270_v62  ;;  %v672_v61 = vunpack.c.l.bf16 %v669_v48  ;;  %v1175_v48 = vld [vmem:[#allocation6] ss:$0 sm:$0xff] (!%p1172_p6) }
  0x4d   : > { %917 = vmatprep.subr.bf16.mxu1 %v1273_v63 }
  0x4f   : > { %877 = vmatpush1.bf16.msra.mxu0 %v1268_v0 }
  0x50   : > { %918 = vmatpush1.bf16.msra.mxu1 %v1271_v1  ;;  %878 = vmatprep.subr.bf16.mxu0 %v1276_v2 }
  0x51   : > { %919 = vmatprep.subr.bf16.mxu1 %v1279_v3 }
  0x53   : > { %879 = vmatpush1.bf16.msra.mxu0 %v1274_v4 }
  0x54   : > { %920 = vmatpush1.bf16.msra.mxu1 %v1277_v5  ;;  %880 = vmatprep.subr.bf16.mxu0 %v1282_v6 }
  0x55   : > { %921 = vmatprep.subr.bf16.mxu1 %v1285_v7  ;;  %v666_v7 = vld [vmem:[#allocation3] sm:$0x3] }
  0x57   : > { %881 = vmatpush1.bf16.msra.mxu0 %v1280_v8 }
  0x58   : > { %922 = vmatpush1.bf16.msra.mxu1 %v1283_v9 }
  0x5a   : > { %899 = vmatmul.mubr.bf16.vlgmr.msra.gmra.mrb[4].mxu0 %v673_v11 }
  0x5b   : > { %940 = vmatmul.mubr.bf16.vlgmr.msra.gmra.mrb[4].mxu1 %v673_v11 }
  0xaa   : > { %v662_v0 = vpop.permute.xlu0 %661 }
  0xab   : > { %vm663_vm2 = vcmp.eq.s32.totalorder %v662_v0, 1 }
 0x10d   : > { %v555_v17 = vpop.f32.mrb[0].mxu0 }
 0x10e   : > { %v596_v18 = vpop.f32.mrb[0].mxu1  ;;  %v557_v20 = vpop.f32.mrb[1].mxu0 }
 0x10f   : > { %v598_v22 = vpop.f32.mrb[1].mxu1  ;;  %v607_v23 = vcombine.low %v555_v17, %v557_v20  ;;  %v559_v25 = vpop.f32.mrb[2].mxu0 }
 0x110   : > { %v608_v24 = vcombine.low %v596_v18, %v598_v22  ;;  %v600_v26 = vpop.f32.mrb[2].mxu1  ;;  %v560_v27 = vpop.f32.mrb[3].mxu0 }
 0x111   : > { %v601_v28 = vpop.f32.mrb[3].mxu1  ;;  %v615_v29 = vrot.slane %v607_v23, %v614_v19  ;;  %v671_v26 = vld [vmem:[#allocation5] sm:$0x3] }
 0x112   : > { %v622_v31 = vrot.slane %v608_v24, %v614_v19  ;;  %v1008_v28 = vpop.permute.xlu0 %1007 }
 0x113   : > { %vm1009_vm3 = vcmp.eq.s32.totalorder %v1008_v28, 1 }
 0x114   : > { %v623_v32 = vcombine.low %v615_v29, %v622_v31 }
 0x116   : > { %v625_v33 = vadd.f32 %v623_v32, %v327_v30 }
 0x118   : > { %v1134_v34 = vmul.f32 -1.442695, %v625_v33  ;;  %v633_v36 = vrot.slane %v625_v33, 2  ;;  %v644_v38 = vrot.slane %v625_v33, 6  ;;  %v641_v41 = vrot.slane %v625_v33, 4 }
 0x119   : > { %v1012_v33 = vld [vmem:[#allocation5] sm:$0x3] }
 0x11a   : > { %1286 = vpow2.f32 %v1134_v34  ;;  %v1135_v37 = vmul.f32 -1.442695, %v633_v36  ;;  %v1136_v39 = vmul.f32 -1.442695, %v644_v38 }
 0x11c   : > { %1288 = vpow2.f32 %v1135_v37 }
 0x11d   : > { %1290 = vpow2.f32 %v1136_v39 }
 0x124   : > { %v1287_v40 = vpop.eup %1286 }
 0x125   : > { %v629_v42 = vadd.f32 1.0, %v1287_v40 }
 0x126   : > { %v1289_v43 = vpop.eup %1288 }
 0x127   : > { %1292 = vrcp.f32 %v629_v42  ;;  %v638_v44 = vadd.f32 1.0, %v1289_v43  ;;  %v1291_v50 = vpop.eup %1290 }
 0x128   : > { %1294 = vtanh.f32 %v641_v41  ;;  %v649_v1 = vadd.f32 1.0, %v1291_v50  ;;  %v1173_v41 = vld [vmem:[%s1641_s5] ss:$0 sm:$0xff] (!%p1172_p6) }
 0x129   : > { %1296 = vrcp.f32 %v638_v44  ;;  %v1174_v44 = vld [vmem:[%s1642_s6] ss:$0 sm:$0xff] (!%p1172_p6) }
 0x12a   : > { %1298 = vrcp.f32 %v649_v1 }
 0x12d   : > { %v900_v45 = vpop.f32.mrb[4].mxu0 }
 0x12e   : > { %v941_v46 = vpop.f32.mrb[4].mxu1  ;;  %v902_v47 = vpop.f32.mrb[5].mxu0 }
 0x12f   : > { %v943_v49 = vpop.f32.mrb[5].mxu1  ;;  %v952_v51 = vcombine.low %v900_v45, %v902_v47  ;;  %v904_v53 = vpop.f32.mrb[6].mxu0 }
 0x130   : > { %v953_v52 = vcombine.low %v941_v46, %v943_v49  ;;  %v945_v54 = vpop.f32.mrb[6].mxu1  ;;  %v905_v56 = vpop.f32.mrb[7].mxu0 }
 0x131   : > { %v1293_v55 = vpop.eup %1292  ;;  %v946_v57 = vpop.f32.mrb[7].mxu1  ;;  %v960_v60 = vrot.slane %v952_v51, %v614_v19 }
 0x132   : > { %v1295_v59 = vpop.eup %1294  ;;  %v967_v62 = vrot.slane %v953_v52, %v614_v19 }
 0x133   : > { %v1297_v63 = vpop.eup %1296  ;;  %v653_v4 = vmul.f32 %v1295_v59, %v1293_v55 }
 0x134   : > { %v968_v2 = vcombine.low %v960_v60, %v967_v62  ;;  %v652_v3 = vmul.f32 %v1297_v63, %v326_v58  ;;  %v1299_v14 = vpop.eup %1298 }
 0x136   : > { %v970_v5 = vadd.f32 %v968_v2, %v672_v61  ;;  %v654_v6 = vadd.f32 %v653_v4, %v652_v3 }
 0x138   : > { %v1169_v8 = vmul.f32 -1.442695, %v970_v5  ;;  %v978_v9 = vrot.slane %v970_v5, 2  ;;  %1300 = vtanh.f32 %v654_v6  ;;  %v667_v11 = vsel %vm663_vm2, %v654_v6, %v666_v7 }
 0x139   : > { %668 = vst [vmem:[#allocation3] sm:$0x3] %v667_v11  ;;  %v989_v13 = vrot.slane %v970_v5, 6  ;;  %v986_v18 = vrot.slane %v970_v5, 4 }
 0x13a   : > { %1302 = vpow2.f32 %v1169_v8  ;;  %v1170_v12 = vmul.f32 -1.442695, %v978_v9 }
 0x13b   : > { %v1171_v15 = vmul.f32 -1.442695, %v989_v13 }
 0x13c   : > { %1304 = vpow2.f32 %v1170_v12 }
 0x13d   : > { %1306 = vpow2.f32 %v1171_v15 }
 0x142   : > { %v1301_v16 = vpop.eup %1300 }
 0x143   : > { %v656_v19 = vmul.f32 %v1301_v16, %v1299_v14 }
 0x144   : > { %v1303_v17 = vpop.eup %1302 }
 0x145   : > { %v974_v20 = vadd.f32 1.0, %v1303_v17  ;;  %v664_v22 = vsel %vm663_vm2, %v656_v19, %v1504_v35 }
 0x146   : > { %v1305_v21 = vpop.eup %1304  ;;  %665 = vst [vmem:[#allocation2] sm:$0x3] %v664_v22 }
 0x147   : > { %1308 = vrcp.f32 %v974_v20  ;;  %v983_v23 = vadd.f32 1.0, %v1305_v21  ;;  %v1307_v24 = vpop.eup %1306 }
 0x148   : > { %1310 = vtanh.f32 %v986_v18  ;;  %v994_v30 = vadd.f32 1.0, %v1307_v24 }
 0x149   : > { %1312 = vrcp.f32 %v983_v23 }
 0x14a   : > { %1314 = vrcp.f32 %v994_v30 }
 0x14d   : > { %v1019_v40 = vld [vmem:[#allocation2] sm:$0x3] (!%p1172_p6) }
 0x14e   : > { %v1027_v42 = vmul.f32 (!%p1172_p6), %v1173_v41, %v1019_v40 }
 0x150   : > { %v1029_v46 = vsel (!%p1172_p6), %vm1028_vm4, %v1027_v42, 0.0 }
 0x151   : > { %v1309_v25 = vpop.eup %1308  ;;  %1030 = vadd.xlane.f32.xlu0 (!%p1172_p6), %v1029_v46 }
 0x152   : > { %v1311_v27 = vpop.eup %1310 }
 0x153   : > { %v1313_v29 = vpop.eup %1312  ;;  %v998_v32 = vmul.f32 %v1311_v27, %v1309_v25 }
 0x154   : > { %v997_v31 = vmul.f32 %v1313_v29, %v671_v26  ;;  %v1315_v36 = vpop.eup %1314 }
 0x156   : > { %v999_v34 = vadd.f32 %v998_v32, %v997_v31 }
 0x158   : > { %1316 = vtanh.f32 %v999_v34  ;;  %v1013_v35 = vsel %vm1009_vm3, %v999_v34, %v1012_v33 }
 0x159   : > { %1014 = vst [vmem:[#allocation5] sm:$0x3] %v1013_v35 }
 0x160   : > { %1018 = sbr.rel (%p1172_p6) target bundleno = 516 (0x204), region = 60 }
 0x162   : > { %v1317_v37 = vpop.eup %1316 }
 0x163   : > { %v1001_v38 = vmul.f32 %v1317_v37, %v1315_v36 }
 0x165   : > { %v1010_v39 = vsel %vm1009_vm3, %v1001_v38, %v1613_v10 }
 0x166   : > { %1011 = vst [vmem:[#allocation4] sm:$0x3] %v1010_v39 }
 0x16d   : > { %v1032_v43 = vld [vmem:[#allocation4] sm:$0x3] }
 0x16e   : > { %v1040_v45 = vmul.f32 %v1174_v44, %v1032_v43 }
 0x170   : > { %v1041_v10 = vsel %vm1028_vm4, %v1040_v45, 0.0 }
 0x171   : > { %1042 = vadd.xlane.f32.xlu0 %v1041_v10 }
 0x1de   : > { %v1031_v47 = vpop.xlane.xlu0 %1030 }
 0x1fe   : > { %v1043_v49 = vpop.xlane.xlu0 %1042 }
 0x1ff   : > { %v1044_v50 = vadd.f32 %v1043_v49, %v1031_v47 }
 0x201   : > { %v1052_v51 = vadd.f32 %v1175_v48, %v1044_v50 }
 0x203   : > { %1054 = vst.msk [vmem:[%s1644_s8] sm:$0x3] %vm1053_vm5, %v1052_v51 }
 0x204 PF: > { %s20_s29 = sadd.s32 1, %s1324_s29  }
 0x205   : > { %p17_p7 = scmp.ge.s32.totalorder %s20_s29, 10  }
 0x207   :  { %19 = sbr.rel (!%p17_p7) target bundleno = 3 (0x3), region = 89 }

</bundles_post_ra>
